<compile_context>
chip_gen: v5e
topology: v5e:2x2
jax: 0.10.0
libtpu: 0.0.40
codegen_flags: <defaults>
</compile_context>

<pallas_src>
import math
import numpy as np
import jax
import jax.numpy as jnp
from jax.experimental import pallas as pl
from jax.experimental.pallas import tpu as pltpu


def _round_up(v, m):
    return -(-v // m) * m


def _vmem_capacity_bytes():
    try:
        return int(pltpu.get_tpu_info().vmem_capacity_bytes)
    except Exception:
        return 64 << 20  # v7x-conservative fallback


def _choose_tb(B, P8, vmem_need, vmem_cap, batch_tile):
    """Pick the batch tile: multiple of 8, bounded by a live-slab/VMEM budget,
    minimizing batch padding and preferring a >=2-step grid when B allows."""
    B8 = _round_up(B, 8)
    if batch_tile is not None:
        return max(8, min(_round_up(batch_tile, 8), B8))
    # lhs / h1 / h2 each hold ~TB*P8 sublane rows; keep them to a few dozen vregs
    # to limit spill traffic, but large enough to amortize ~0.35us/grid-step.
    rows_budget = 512
    cap = min(64, B8, max(8, (rows_budget // max(P8, 1)) // 8 * 8))
    vmem_budget = int(0.45 * vmem_cap)
    best_t, best_cost = 8, None
    for t in range(8, cap + 1, 8):
        if t > 8 and vmem_need(t) > vmem_budget:
            continue
        bp = _round_up(B, t)
        steps = bp // t
        # cost: dead padded batch rows + per-step overhead, plus a nudge towards
        # a >=2-step grid (v7x two-TensorCore sharding + DMA prefetch overlap).
        cost = (bp - B) + 2 * steps + (8 if (steps < 2 and B8 > 8) else 0)
        if best_cost is None or cost < best_cost:
            best_t, best_cost = t, cost
    return best_t


def fcn_head_forward(x_ncl, w1, b1, w2, b2, *, batch_tile=None,
                     compute_dtype=jnp.bfloat16):
    """x_ncl: (B, C_in, L) float32, exactly what PyTorch's Conv1d receives.
    Returns (B, n_class) float32."""
    B, C, L = x_ncl.shape
    NC, _, K1 = w1.shape
    K2 = w2.shape[-1]
    assert K2 == 3, "FCN_head's second conv always has kernel_size=3"

    L1 = (L - K1) // 2 + 1                 # conv1 out length (stride 2, no pad)
    L2 = (L1 - K2) // 2 + 1                # conv2 out length (stride 2, no pad)
    Lp = L2 // 4                           # AvgPool1d(4,4) out length (tail dropped)
    n4 = 4 * Lp                            # final result = mean of first n4 conv2 outs
    assert L >= K1 and L1 >= K2 and Lp >= 1, "sequence too short for this head"

    # --- static geometry -----------------------------------------------------
    # conv2 output p consumes x[4p .. 4p+K1+3]. Fold the total stride of 4 into
    # the channel axis (x -> (B, Q, 4*C)); conv1 then produces the triple
    # (h1[2p], h1[2p+1], h1[2p+2]) per position p with T1 unit-stride taps, and
    # conv2 is one unit-stride matmul on that triple.
    P8 = _round_up(n4, 8)                  # pooled positions, sublane aligned
    T1 = -(-(K1 + 4) // 4)                 # ceil((K1+4)/4) fold-by-4 taps
    Q = P8 + T1 - 1                        # folded positions consumed per batch
    Lx = 4 * Q                             # x samples consumed (pad/truncate)
    C4 = 4 * C
    NH = _round_up(3 * NC, 128)            # conv1 triple lanes (zero padded)
    NCp = _round_up(NC, 128)               # conv2 / output lanes (zero padded)
    itemsize = np.dtype(compute_dtype).itemsize
    inv_n4 = 1.0 / n4

    vmem_cap = _vmem_capacity_bytes()

    def vmem_need(tb):
        rows = tb * P8
        x_tile = tb * Q * C4 * itemsize
        out_tile = tb * NCp * 4
        slabs = rows * (T1 * C4 * itemsize + NH * (4 + itemsize) + NCp * 4)
        weights = (T1 * C4 * NH + NH * NCp) * itemsize + (NH + NCp) * 4
        return 2 * (x_tile + out_tile) + weights + slabs    # double-buffered I/O

    TB = _choose_tb(B, P8, vmem_need, vmem_cap, batch_tile)
    B_pad = _round_up(B, TB)
    grid = B_pad // TB
    # TODO(synk): for extreme L*C where even TB=8 exceeds the VMEM budget, tile
    # the Q axis as a second ("arbitrary") grid dimension.

    # --- layout glue (plain JAX; cast+transpose+pad+reshape fuse into one copy)
    # TODO(synk): accept (B, L, C) inputs from the producer to skip this
    # NCL->NLC transpose copy of x in HBM.
    x_lc = jnp.transpose(x_ncl.astype(compute_dtype), (0, 2, 1))      # (B, L, C)
    if Lx <= L:
        x_lc = x_lc[:, :Lx, :]
    else:
        x_lc = jnp.pad(x_lc, ((0, 0), (0, Lx - L), (0, 0)))
    x4 = x_lc.reshape(B, Q, C4)                                       # stride folded
    if B_pad > B:
        x4 = jnp.pad(x4, ((0, B_pad - B), (0, 0), (0, 0)))
    # Zero padding beyond L is safe: every conv2 output p < n4 reads only
    # x[4p .. 4p+K1+3] <= x[L-1]; positions p >= n4 (which may touch padding)
    # are zeroed by the pool mask in-kernel.

    # conv1 weights repacked for the folded layout. Triple slot t (=0,1,2) is
    # h1[2p+t]; its weight for fold-slot m, channel c, tap j is
    # w1[:, c, 4j + m - 2t] (zero when out of range).
    w1_t = jnp.transpose(w1, (2, 1, 0)).astype(jnp.float32)           # (K1, C, NC)

    def slot_weights(shift):
        padded = jnp.pad(w1_t, ((shift, 4 * T1 - K1 - shift), (0, 0), (0, 0)))
        return padded.reshape(T1, C4, NC)

    w1_trip = jnp.concatenate(
        [slot_weights(0), slot_weights(2), slot_weights(4)], axis=-1)  # (T1,4C,3NC)
    w1_trip = jnp.pad(w1_trip, ((0, 0), (0, 0), (0, NH - 3 * NC)))
    w1_f = w1_trip.reshape(T1 * C4, NH).astype(compute_dtype)          # fused-K RHS
    b1_f = jnp.pad(jnp.concatenate([b1, b1, b1]), (0, NH - 3 * NC))
    b1_f = b1_f.reshape(1, NH).astype(jnp.float32)

    # conv2 weights consume the whole (h1[2p], h1[2p+1], h1[2p+2]) triple.
    w2_full = jnp.transpose(w2, (2, 1, 0)).reshape(3 * NC, NC)
    w2_f = jnp.pad(w2_full, ((0, NH - 3 * NC), (0, NCp - NC))).astype(compute_dtype)
    b2_f = jnp.pad(b2, (0, NCp - NC)).reshape(1, NCp).astype(jnp.float32)

    def kernel(x_ref, w1_ref, b1_ref, w2_ref, b2_ref, o_ref):
        # ---- conv1 + ReLU: one matmul over the lane-concatenated taps --------
        parts = [x_ref[:, pl.ds(j, P8), :].reshape(TB * P8, C4)   # unit-stride
                 for j in range(T1)]
        lhs = parts[0] if T1 == 1 else jnp.concatenate(parts, axis=-1)
        h1 = jnp.dot(lhs, w1_ref[...], preferred_element_type=jnp.float32)
        h1 = jnp.maximum(h1 + b1_ref[...], 0.0).astype(compute_dtype)  # (rows, NH)

        # ---- conv2 (k=3, stride 2) + ReLU: single matmul on the triple -------
        h2 = jnp.dot(h1, w2_ref[...], preferred_element_type=jnp.float32)
        h2 = jnp.maximum(h2 + b2_ref[...], 0.0)                        # (rows, NCp) f32

        # ---- AvgPool1d(4,4) + AdaptiveAvgPool1d(1) == mean of first n4 outs --
        pos = jax.lax.broadcasted_iota(jnp.int32, (1, P8, NCp), 1)
        pool_w = jnp.where(pos < n4, inv_n4, 0.0)                      # tiny mask
        o_ref[...] = jnp.sum(h2.reshape(TB, P8, NCp) * pool_w, axis=1)  # (TB, NCp)

    vmem_limit = int(min(0.9 * vmem_cap, max(32 << 20, 4 * vmem_need(TB))))

    out = pl.pallas_call(
        kernel,
        out_shape=jax.ShapeDtypeStruct((B_pad, NCp), jnp.float32),
        grid_spec=pltpu.PrefetchScalarGridSpec(
            num_scalar_prefetch=0,
            grid=(grid,),
            in_specs=[
                pl.BlockSpec((TB, Q, C4), lambda b: (b, 0, 0)),     # x, batch-tiled
                pl.BlockSpec((T1 * C4, NH), lambda b: (0, 0)),      # w1 (fused-K)
                pl.BlockSpec((1, NH), lambda b: (0, 0)),            # b1 (tripled)
                pl.BlockSpec((NH, NCp), lambda b: (0, 0)),          # w2 (stacked)
                pl.BlockSpec((1, NCp), lambda b: (0, 0)),           # b2
            ],
            out_specs=pl.BlockSpec((TB, NCp), lambda b: (b, 0)),    # lane-dense store
        ),
        compiler_params=pltpu.CompilerParams(
            dimension_semantics=("parallel",),      # batch elements independent
            vmem_limit_bytes=vmem_limit,
        ),
    )(x4, w1_f, b1_f, w2_f, b2_f)
    return out[:B, :NC]


def fcn_head_ref(x, w1, b1, w2, b2):
    """Pure-JAX reference with the exact PyTorch semantics (NCL)."""
    dn = ("NCH", "OIH", "NCH")
    h = jax.lax.conv_general_dilated(x, w1, (2,), "VALID", dimension_numbers=dn)
    h = jnp.maximum(h + b1[None, :, None], 0.0)
    h = jax.lax.conv_general_dilated(h, w2, (2,), "VALID", dimension_numbers=dn)
    h = jnp.maximum(h + b2[None, :, None], 0.0)
    L2 = h.shape[-1]
    Lp = L2 // 4
    h = h[..., : 4 * Lp].reshape(h.shape[0], h.shape[1], Lp, 4).mean(-1)  # AvgPool1d(4,4)
    return h.mean(-1)                                # AdaptiveAvgPool1d(1) + Flatten


if __name__ == "__main__":
    # Small, deterministic setup consistent with the module:
    # input (batch, in_channels, seq_len) as consumed by the first Conv1d.
    B, C_in, L = 2, 16, 64
    n_class, kernel_size = 5, 8

    key = jax.random.PRNGKey(0)
    kx, kw1, kb1, kw2, kb2 = jax.random.split(key, 5)

    x = jax.random.normal(kx, (B, C_in, L), dtype=jnp.float32)

    bound1 = 1.0 / math.sqrt(C_in * kernel_size)
    w1 = jax.random.uniform(kw1, (n_class, C_in, kernel_size), jnp.float32, -bound1, bound1)
    b1 = jax.random.uniform(kb1, (n_class,), jnp.float32, -bound1, bound1)
    bound2 = 1.0 / math.sqrt(n_class * 3)
    w2 = jax.random.uniform(kw2, (n_class, n_class, 3), jnp.float32, -bound2, bound2)
    b2 = jax.random.uniform(kb2, (n_class,), jnp.float32, -bound2, bound2)

    out = jax.block_until_ready(fcn_head_forward(x, w1, b1, w2, b2))
    ref = jax.block_until_ready(fcn_head_ref(x, w1, b1, w2, b2))

    assert out.shape == (B, n_class)
    # bf16 MXU inputs (f32 accumulation) -> loosened tolerance vs the f32 reference.
    assert jnp.allclose(out, ref, rtol=3e-2, atol=1e-2), (out, ref)

    print("KERNEL_OK")
</pallas_src>

<mosaic_0001>
module attributes {stable_mosaic.version = 11 : i64} {
  func.func @kernel(%arg0: i32, %arg1: memref<8x18x64xbf16, #tpu.memory_space<vmem>>, %arg2: memref<192x128xbf16, #tpu.memory_space<vmem>>, %arg3: memref<1x128xf32, #tpu.memory_space<vmem>>, %arg4: memref<128x128xbf16, #tpu.memory_space<vmem>>, %arg5: memref<1x128xf32, #tpu.memory_space<vmem>>, %arg6: memref<8x128xf32, #tpu.memory_space<vmem>>) attributes {dimension_semantics = [#tpu.dimension_semantics<parallel>], iteration_bounds = array<i64: 1>, scalar_prefetch = 0 : i64, scratch_operands = 0 : i64, tpu.core_type = #tpu.core_type<tc>, window_params = [{transform_indices = @transform_0, window_bounds = array<i64: 8, 18, 64>}, {pipeline_mode = #tpu.pipeline_mode<synchronous>, transform_indices = @transform_1, window_bounds = array<i64: 192, 128>}, {pipeline_mode = #tpu.pipeline_mode<synchronous>, transform_indices = @transform_2, window_bounds = array<i64: 1, 128>}, {pipeline_mode = #tpu.pipeline_mode<synchronous>, transform_indices = @transform_3, window_bounds = array<i64: 128, 128>}, {pipeline_mode = #tpu.pipeline_mode<synchronous>, transform_indices = @transform_4, window_bounds = array<i64: 1, 128>}, {transform_indices = @transform_5, window_bounds = array<i64: 8, 128>}]} {
    %c0 = arith.constant 0 : index
    %c0_0 = arith.constant 0 : index
    %c0_1 = arith.constant 0 : index
    %0 = vector.load %arg1[%c0, %c0_0, %c0_1] : memref<8x18x64xbf16, #tpu.memory_space<vmem>>, vector<8x16x64xbf16>
    %1 = vector.shape_cast %0 : vector<8x16x64xbf16> to vector<128x64xbf16>
    %c0_2 = arith.constant 0 : index
    %c1 = arith.constant 1 : index
    %c0_3 = arith.constant 0 : index
    %2 = vector.load %arg1[%c0_2, %c1, %c0_3] : memref<8x18x64xbf16, #tpu.memory_space<vmem>>, vector<8x16x64xbf16>
    %3 = vector.shape_cast %2 : vector<8x16x64xbf16> to vector<128x64xbf16>
    %c0_4 = arith.constant 0 : index
    %c2 = arith.constant 2 : index
    %c0_5 = arith.constant 0 : index
    %4 = vector.load %arg1[%c0_4, %c2, %c0_5] : memref<8x18x64xbf16, #tpu.memory_space<vmem>>, vector<8x16x64xbf16>
    %5 = vector.shape_cast %4 : vector<8x16x64xbf16> to vector<128x64xbf16>
    %6 = tpu.concatenate %1, %3, %5 in 1 : vector<128x64xbf16>, vector<128x64xbf16>, vector<128x64xbf16> -> vector<128x192xbf16>
    %c0_6 = arith.constant 0 : index
    %c0_7 = arith.constant 0 : index
    %7 = vector.load %arg2[%c0_6, %c0_7] : memref<192x128xbf16, #tpu.memory_space<vmem>>, vector<192x128xbf16>
    %cst = arith.constant dense<0.000000e+00> : vector<128x128xf32>
    %8 = tpu.matmul %6, %7, %cst {dimension_numbers = #tpu.dot_dimension_numbers<[1], [0], [0], [1], [0, 0, 1, 1], [], []>} : vector<128x192xbf16>, vector<192x128xbf16>, vector<128x128xf32> -> vector<128x128xf32>
    %c0_8 = arith.constant 0 : index
    %c0_9 = arith.constant 0 : index
    %9 = vector.load %arg3[%c0_8, %c0_9] : memref<1x128xf32, #tpu.memory_space<vmem>>, vector<1x128xf32>
    %10 = vector.broadcast %9 : vector<1x128xf32> to vector<128x128xf32>
    %11 = arith.addf %8, %10 : vector<128x128xf32>
    %cst_10 = arith.constant 0.000000e+00 : f32
    %12 = vector.broadcast %cst_10 : f32 to vector<128x128xf32>
    %13 = arith.maximumf %11, %12 : vector<128x128xf32>
    %14 = arith.truncf %13 : vector<128x128xf32> to vector<128x128xbf16>
    %c0_11 = arith.constant 0 : index
    %c0_12 = arith.constant 0 : index
    %15 = vector.load %arg4[%c0_11, %c0_12] : memref<128x128xbf16, #tpu.memory_space<vmem>>, vector<128x128xbf16>
    %cst_13 = arith.constant dense<0.000000e+00> : vector<128x128xf32>
    %16 = tpu.matmul %14, %15, %cst_13 {dimension_numbers = #tpu.dot_dimension_numbers<[1], [0], [0], [1], [0, 0, 1, 1], [], []>} : vector<128x128xbf16>, vector<128x128xbf16>, vector<128x128xf32> -> vector<128x128xf32>
    %c0_14 = arith.constant 0 : index
    %c0_15 = arith.constant 0 : index
    %17 = vector.load %arg5[%c0_14, %c0_15] : memref<1x128xf32, #tpu.memory_space<vmem>>, vector<1x128xf32>
    %18 = vector.broadcast %17 : vector<1x128xf32> to vector<128x128xf32>
    %19 = arith.addf %16, %18 : vector<128x128xf32>
    %cst_16 = arith.constant 0.000000e+00 : f32
    %20 = vector.broadcast %cst_16 : f32 to vector<128x128xf32>
    %21 = arith.maximumf %19, %20 : vector<128x128xf32>
    %22 = tpu.iota {dimensions = array<i32: 1>} : vector<1x16x128xi32>
    %c12_i32 = arith.constant 12 : i32
    %23 = vector.broadcast %c12_i32 : i32 to vector<1x16x128xi32>
    %24 = arith.cmpi slt, %22, %23 : vector<1x16x128xi32>
    %cst_17 = arith.constant 0.0833333358 : f32
    %cst_18 = arith.constant 0.000000e+00 : f32
    %25 = vector.broadcast %cst_17 : f32 to vector<1x16x128xf32>
    %26 = vector.broadcast %cst_18 : f32 to vector<1x16x128xf32>
    %27 = arith.select %24, %25, %26 : vector<1x16x128xi1>, vector<1x16x128xf32>
    %28 = vector.shape_cast %21 : vector<128x128xf32> to vector<8x16x128xf32>
    %29 = vector.broadcast %27 : vector<1x16x128xf32> to vector<8x16x128xf32>
    %30 = arith.mulf %28, %29 : vector<8x16x128xf32>
    %cst_19 = arith.constant dense<0.000000e+00> : vector<8x128xf32>
    %31 = vector.multi_reduction <add>, %30, %cst_19 [1] : vector<8x16x128xf32> to vector<8x128xf32>
    %c0_20 = arith.constant 0 : index
    %c0_21 = arith.constant 0 : index
    %32 = vector.load %arg6[%c0_20, %c0_21] : memref<8x128xf32, #tpu.memory_space<vmem>>, vector<8x128xf32>
    tpu.vector_store %arg6[%c0_20, %c0_21], %31 {strides = array<i32>} : memref<8x128xf32, #tpu.memory_space<vmem>>, vector<8x128xf32>,
    return
  }
  func.func @transform_0(%arg0: i32) -> (i32, i32, i32) {
    %c0_i32 = arith.constant 0 : i32
    %c0_i32_0 = arith.constant 0 : i32
    %c0_i32_1 = arith.constant 0 : i32
    return %arg0, %c0_i32, %c0_i32_0 : i32, i32, i32
  }
  func.func @transform_1(%arg0: i32) -> (i32, i32) {
    %c0_i32 = arith.constant 0 : i32
    %c0_i32_0 = arith.constant 0 : i32
    %c0_i32_1 = arith.constant 0 : i32
    return %c0_i32, %c0_i32_0 : i32, i32
  }
  func.func @transform_2(%arg0: i32) -> (i32, i32) {
    %c0_i32 = arith.constant 0 : i32
    %c0_i32_0 = arith.constant 0 : i32
    %c0_i32_1 = arith.constant 0 : i32
    return %c0_i32, %c0_i32_0 : i32, i32
  }
  func.func @transform_3(%arg0: i32) -> (i32, i32) {
    %c0_i32 = arith.constant 0 : i32
    %c0_i32_0 = arith.constant 0 : i32
    %c0_i32_1 = arith.constant 0 : i32
    return %c0_i32, %c0_i32_0 : i32, i32
  }
  func.func @transform_4(%arg0: i32) -> (i32, i32) {
    %c0_i32 = arith.constant 0 : i32
    %c0_i32_0 = arith.constant 0 : i32
    %c0_i32_1 = arith.constant 0 : i32
    return %c0_i32, %c0_i32_0 : i32, i32
  }
  func.func @transform_5(%arg0: i32) -> (i32, i32) {
    %c0_i32 = arith.constant 0 : i32
    %c0_i32_0 = arith.constant 0 : i32
    return %arg0, %c0_i32 : i32, i32
  }
}

</mosaic_0001>

<bundles_post_ra>
// kernel: tpu_custom_call.1
= control target key start
LH: loop header
LB: loop body
LE: loop exit
PB: predicated region body
PF: predicated region fallthrough
CT: control target
= control target key end

     0   :  { %vm46_vm0 = vsmask.f32 3328  ;;  %vm47_vm1 = vsmask.f32 7440  ;;  %s1162_s27 = smov 64   ;;  %s1630_s0 = inlined_call_operand.vmem [shape: bf16[8,18,64], index: 0, kind: input, shape index: {}]   ;;  %s1631_s1 = inlined_call_operand.vmem [shape: bf16[192,128], index: 1, kind: input, shape index: {}]   ;;  %s1632_s2 = inlined_call_operand.vmem [shape: f32[1,128], index: 2, kind: input, shape index: {}]   ;;  %s1633_s3 = inlined_call_operand.vmem [shape: bf16[128,128], index: 3, kind: input, shape index: {}]   ;;  %s1634_s4 = inlined_call_operand.vmem [shape: f32[1,128], index: 4, kind: input, shape index: {}]   ;;  %s1635_s5 = inlined_call_operand.hbm [shape: f32[8,128], index: 5, kind: output, shape index: {}]  }
   0x1   :  { %v22_v0 = vld [vmem:[%s1630_s0] sm:$0xf]  ;;  %v1201_v1 = vld [vmem:[%s1630_s0 + $0x4] sm:$0xf]  ;;  %v1206_v2 = vld [vmem:[%s1630_s0 + $0x8] sm:$0x1] }
   0x2   :  { %v50_v3 = vshrl.u32 %v22_v0, 16  ;;  %v53_v4 = vshll.u32 %v22_v0, 16  ;;  %v59_v5 = vshll.u32 %v1201_v1, 16  ;;  %v63_v6 = vshrl.u32 %v1201_v1, 16  ;;  %v24_v8 = vld [vmem:[%s1630_s0 + $0xc] sm:$0xf]  ;;  %vm1234_vm2 = vmor %vm46_vm0, %vm47_vm1 }
   0x3   :  { %v69_v7 = vshll.u32 %v1206_v2, 16  ;;  %v1217_v11 = vld [vmem:[%s1630_s0 + $0x10] sm:$0xf]  ;;  %v1222_v12 = vld [vmem:[%s1630_s0 + $0x14] sm:$0x1]  ;;  %v74_v16 = vshrl.u32 %v24_v8, 16 }
   0x4   :  { %v52_v9 = vrot.slane %v50_v3, 4  ;;  %v55_v10 = vrot.slane %v53_v4, 5  ;;  %v61_v13 = vrot.slane %v59_v5, 5  ;;  %v65_v14 = vrot.slane %v63_v6, 4  ;;  %v26_v17 = vld [vmem:[%s1630_s0 + $0x18] sm:$0xf] }
   0x5   :  { %v71_v15 = vrot.slane %v69_v7, 5  ;;  %v77_v19 = vshll.u32 %v24_v8, 16  ;;  %v83_v20 = vshll.u32 %v1217_v11, 16  ;;  %v87_v21 = vshrl.u32 %v1217_v11, 16  ;;  %v1106_v22 = vld [vmem:[%s1631_s1 + $0x58] sm:$0xff]  ;;  %v1105_v33 = vld [vmem:[%s1631_s1 + $0x50] sm:$0xff] }
   0x6   :  { %v56_v18 = vor.u32 %v55_v10, %v52_v9  ;;  %v66_v24 = vor.u32 %v65_v14, %v61_v13  ;;  %v76_v25 = vrot.slane %v74_v16, 4  ;;  %v93_v26 = vshll.u32 %v1222_v12, 16  ;;  %v1242_v27 = vld [vmem:[%s1630_s0 + $0x1c] sm:$0xf]  ;;  %638 = vmatpush.bf16.msra.mxu1 %v1106_v22  ;;  %v1252_v41 = vld [vmem:[%s1630_s0 + $0x20] sm:$0x1] }
   0x7   :  { %v98_v28 = vshrl.u32 %v26_v17, 16  ;;  %v79_v30 = vrot.slane %v77_v19, 5  ;;  %v85_v31 = vrot.slane %v83_v20, 5  ;;  %v89_v32 = vrot.slane %v87_v21, 4  ;;  %v28_v43 = vld [vmem:[%s1630_s0 + $0x24] sm:$0xf] }
   0x8   :  { %v57_v29 = vrot.slane %v56_v18, 4  ;;  %v67_v34 = vrot.slane %v66_v24, 4  ;;  %v95_v35 = vrot.slane %v93_v26, 5  ;;  %v101_v37 = vshll.u32 %v26_v17, 16  ;;  %v1104_v52 = vld [vmem:[%s1631_s1 + $0x48] sm:$0xff]  ;;  %v1103_v6 = vld [vmem:[%s1631_s1 + $0x40] sm:$0xff] }
   0x9   :  { %v100_v36 = vrot.slane %v98_v28, 4  ;;  %v80_v39 = vor.u32 %v79_v30, %v76_v25  ;;  %v90_v40 = vor.u32 %v89_v32, %v85_v31  ;;  %v107_v42 = vshll.u32 %v1242_v27, 16  ;;  %v1268_v56 = vld [vmem:[%s1630_s0 + $0x28] sm:$0xf]  ;;  %v1277_v61 = vld [vmem:[%s1630_s0 + $0x2c] sm:$0x1] }
   0xa   :  { %v62_v38 = vsel %vm1234_vm2, %v57_v29, %v61_v13  ;;  %v72_v44 = vsel %vm1234_vm2, %v67_v34, %v71_v15  ;;  %v103_v46 = vrot.slane %v101_v37, 5  ;;  %v111_v47 = vshrl.u32 %v1242_v27, 16  ;;  %639 = vmatpush.bf16.msra.mxu1 %v1105_v33  ;;  %v36_v5 = vld [vmem:[%s1630_s0 + $0x54] sm:$0xf]  ;;  %v1293_v17 = vld [vmem:[%s1630_s0 + $0x58] sm:$0xf] }
   0xb   :  { %v364_v45 = vunpack.c.l.b16 %v62_v38  ;;  %v365_v48 = vunpack.c.l.b16 %v72_v44  ;;  %v81_v49 = vrot.slane %v80_v39, 4  ;;  %v91_v50 = vrot.slane %v90_v40, 4 }
   0xc   :  { %v109_v51 = vrot.slane %v107_v42, 5  ;;  %v104_v53 = vor.u32 %v103_v46, %v100_v36  ;;  %v113_v54 = vrot.slane %v111_v47, 4  ;;  %v117_v55 = vshll.u32 %v1252_v41, 16 }
   0xd   :  { %v122_v57 = vshrl.u32 %v28_v43, 16  ;;  %v380_v58 = vpack.c.b16 %v365_v48, %v364_v45  ;;  %v86_v59 = vsel %vm1234_vm2, %v81_v49, %v85_v31  ;;  %v96_v60 = vsel %vm1234_vm2, %v91_v50, %v95_v35 }
   0xe   :  { %v125_v62 = vshll.u32 %v28_v43, 16  ;;  %v366_v63 = vunpack.c.l.b16 %v86_v59  ;;  %v367_v0 = vunpack.c.l.b16 %v96_v60  ;;  %v105_v3 = vrot.slane %v104_v53, 4  ;;  %640 = vmatpush.bf16.msra.mxu1 %v1104_v52 }
   0xf   :  { %v114_v4 = vor.u32 %v113_v54, %v109_v51  ;;  %388 = vrot.lane.b32.xlu0 %v380_v58, %s1162_s27  ;;  %v119_v7 = vrot.slane %v117_v55, 5  ;;  %v124_v8 = vrot.slane %v122_v57, 4  ;;  %v131_v10 = vshll.u32 %v1268_v56, 16 }
  0x10   :  { %v127_v9 = vrot.slane %v125_v62, 5  ;;  %v381_v13 = vpack.c.b16 %v367_v0, %v366_v63  ;;  %v110_v14 = vsel %vm1234_vm2, %v105_v3, %v109_v51  ;;  %v135_v16 = vshrl.u32 %v1268_v56, 16 }
  0x11   :  { %v115_v15 = vrot.slane %v114_v4, 4 }
  0x12   :  { %10 = vsyncpa [#allocation3], 0  ;;  %v368_v18 = vunpack.c.l.b16 %v110_v14  ;;  %v128_v19 = vor.u32 %v127_v9, %v124_v8  ;;  %v133_v20 = vrot.slane %v131_v10, 5  ;;  %v141_v21 = vshll.u32 %v1277_v61, 16  ;;  %v1301_v25 = vld [vmem:[%s1630_s0 + $0x5c] sm:$0x1]  ;;  %641 = vmatpush.bf16.msra.mxu1 %v1103_v6 }
  0x13   :  { %v120_v22 = vsel %vm1234_vm2, %v115_v15, %v119_v7  ;;  %v137_v24 = vrot.slane %v135_v16, 4  ;;  %v218_v26 = vshrl.u32 %v36_v5, 16  ;;  %v221_v28 = vshll.u32 %v36_v5, 16  ;;  %v34_v33 = vld [vmem:[%s1630_s0 + $0x48] sm:$0xf]  ;;  %v1102_v58 = vld [vmem:[%s1631_s1 + $0x38] sm:$0xff] }
  0x14   :  { %v369_v29 = vunpack.c.l.b16 %v120_v22  ;;  %v129_v30 = vrot.slane %v128_v19, 4  ;;  %v143_v31 = vrot.slane %v141_v21, 5  ;;  %v227_v32 = vshll.u32 %v1293_v17, 16  ;;  %v1311_v38 = vld [vmem:[%s1630_s0 + $0x4c] sm:$0xf]  ;;  %585 = vmatpush.bf16.msra.mxu0 %v1102_v58  ;;  %v1101_v7 = vld [vmem:[%s1631_s1 + $0x30] sm:$0xff]  ;;  %1115 = vmatpush.bf16.msra.mxu3 %v1102_v58 }
  0x15   :  { %v138_v34 = vor.u32 %v137_v24, %v133_v20  ;;  %v220_v35 = vrot.slane %v218_v26, 4  ;;  %v223_v36 = vrot.slane %v221_v28, 5  ;;  %v231_v37 = vshrl.u32 %v1293_v17, 16  ;;  %v1321_v49 = vld [vmem:[%s1630_s0 + $0x50] sm:$0x1]  ;;  %v1100_v28 = vld [vmem:[%s1631_s1 + $0x28] sm:$0xff] }
  0x16   :  { %v382_v39 = vpack.c.b16 %v369_v29, %v368_v18  ;;  %v134_v40 = vsel %vm1234_vm2, %v129_v30, %v133_v20  ;;  %v229_v42 = vrot.slane %v227_v32, 5  ;;  %v237_v43 = vshll.u32 %v1301_v25, 16  ;;  %v241_v6 = vld [vmem:[%s1630_s0] sm:$0xe]  ;;  %v32_v26 = vld [vmem:[%s1630_s0 + $0x3c] sm:$0xf] }
  0x17   :  { %v139_v44 = vrot.slane %v138_v34, 4  ;;  %v370_v45 = vunpack.c.l.b16 %v134_v40  ;;  %v224_v46 = vor.u32 %v223_v36, %v220_v35  ;;  %v233_v47 = vrot.slane %v231_v37, 4  ;;  %390 = vrot.lane.b32.xlu0 %v381_v13, %s1162_s27  ;;  %v1363_v34 = vld [vmem:[%s1630_s0 + $0x40] sm:$0xf]  ;;  %v242_v37 = vld [vmem:[%s1630_s0 + $0xc] sm:$0xe] }
  0x18   :  { %392 = vrot.lane.b32.xlu1 %v382_v39, %s1162_s27  ;;  %v239_v48 = vrot.slane %v237_v43, 5  ;;  %v194_v50 = vshrl.u32 %v34_v33, 16  ;;  %v197_v51 = vshll.u32 %v34_v33, 16  ;;  %v203_v52 = vshll.u32 %v1311_v38, 16  ;;  %586 = vmatpush.bf16.msra.mxu0 %v1101_v7  ;;  %v243_v23 = vld [vmem:[%s1630_s0 + $0x18] sm:$0xe] }
  0x19   :  { %v144_v53 = vsel %vm1234_vm2, %v139_v44, %v143_v31  ;;  %v225_v54 = vrot.slane %v224_v46, 4  ;;  %v234_v55 = vor.u32 %v233_v47, %v229_v42  ;;  %v207_v57 = vshrl.u32 %v1311_v38, 16  ;;  %1116 = vmatpush.bf16.msra.mxu3 %v1101_v7  ;;  %v30_v44 = vld [vmem:[%s1630_s0 + $0x30] sm:$0xf]  ;;  %v1090_v19 = vld [vmem:[%s1630_s0 + $0x24] sm:$0xff]  ;;  %s950_s17 = sshll.u32 %s1635_s5, 4  ;;  %s951_s17 = int_to_ptr.hbm [resolvable:$true] %s950_s17 }
  0x1a   :  { %v371_v59 = vunpack.c.l.b16 %v144_v53  ;;  %v196_v60 = vrot.slane %v194_v50, 4  ;;  %v199_v62 = vrot.slane %v197_v51, 5  ;;  %v205_v63 = vrot.slane %v203_v52, 5  ;;  %v1384_v50 = vld [vmem:[%s1630_s0 + $0x34] sm:$0xf] }
  0x1b   :  { %v230_v0 = vsel %vm1234_vm2, %v225_v54, %v229_v42  ;;  %v235_v3 = vrot.slane %v234_v55, 4  ;;  %v209_v4 = vrot.slane %v207_v57, 4  ;;  %v213_v5 = vshll.u32 %v1321_v49, 16  ;;  %v1374_v42 = vld [vmem:[%s1630_s0 + $0x44] sm:$0x1] }
  0x1c   :  { %v383_v8 = vpack.c.b16 %v371_v59, %v370_v45  ;;  %v378_v9 = vunpack.c.l.b16 %v230_v0  ;;  %v200_v10 = vor.u32 %v199_v62, %v196_v60  ;;  %vm273_vm3 = vcmask 1042432   ;;  %587 = vmatpush.bf16.msra.mxu0 %v1100_v28  ;;  %v1394_v62 = vld [vmem:[%s1630_s0 + $0x38] sm:$0x1] }
  0x1d   :  { %v240_v13 = vsel %vm1234_vm2, %v235_v3, %v239_v48  ;;  %v210_v14 = vor.u32 %v209_v4, %v205_v63  ;;  %v215_v15 = vrot.slane %v213_v5, 5  ;;  %vm274_vm4 = vcmask 1046532   ;;  %1117 = vmatpush.bf16.msra.mxu3 %v1100_v28 }
  0x1e   :  { %v379_v16 = vunpack.c.l.b16 %v240_v13  ;;  %v201_v18 = vrot.slane %v200_v10, 4  ;;  %vm1341_vm5 = vmor %vm273_vm3, %vm274_vm4  ;;  %v959_v20 = vrot.slane %v241_v6, 9  ;;  %v278_v21 = vrot.slane %v1201_v1, 5  ;;  %v1098_v13 = vld [vmem:[%s1631_s1 + $0x18] sm:$0xff] }
  0x1f   :  { %v211_v22 = vrot.slane %v210_v14, 4  ;;  %v281_v24 = vrot.slane %v1206_v2, 5  ;;  %v170_v39 = vshrl.u32 %v32_v26, 16  ;;  %vm428_vm6 = vcmask 523264  }
  0x20   :  { %394 = vrot.lane.b32.xlu1 %v383_v8, %s1162_s27  ;;  %v387_v29 = vpack.c.b16 %v379_v16, %v378_v9  ;;  %v206_v30 = vsel %vm1234_vm2, %v201_v18, %v205_v63  ;;  %v279_v1 = vsel %vm1341_vm5, %v959_v20, %v278_v21  ;;  %v280_v2 = vrot.slane %v278_v21, 4 }
  0x21   :  { %v216_v31 = vsel %vm1234_vm2, %v211_v22, %v215_v15  ;;  %v376_v32 = vunpack.c.l.b16 %v206_v30  ;;  %v404_v33 = vunpack.c.l.b16 %v279_v1  ;;  %v173_v43 = vshll.u32 %v32_v26, 16  ;;  %v1097_v1 = vld [vmem:[%s1631_s1 + $0x10] sm:$0xff] }
  0x22   :  { %402 = vrot.lane.b32.xlu0 %v387_v29, %s1162_s27  ;;  %v377_v35 = vunpack.c.l.b16 %v216_v31  ;;  %v282_v36 = vsel %vm1341_vm5, %v280_v2, %v281_v24  ;;  %v285_v46 = vrot.slane %v1217_v11, 5  ;;  %v172_v47 = vrot.slane %v170_v39, 4 }
  0x23   :  { %v405_v40 = vunpack.c.l.b16 %v282_v36  ;;  %v179_v48 = vshll.u32 %v1363_v34, 16  ;;  %v960_v52 = vrot.slane %v242_v37, 9  ;;  %v175_v53 = vrot.slane %v173_v43, 5  ;;  %v1096_v43 = vld [vmem:[%s1631_s1 + $0x8] sm:$0xff] }
  0x24   :  { %v386_v45 = vpack.c.b16 %v377_v35, %v376_v32  ;;  %v183_v54 = vshrl.u32 %v1363_v34, 16  ;;  %v288_v55 = vrot.slane %v1222_v12, 5  ;;  %v189_v11 = vshll.u32 %v1374_v42, 16  ;;  %v1099_v12 = vld [vmem:[%s1631_s1 + $0x20] sm:$0xff] }
  0x25   :  { %v420_v51 = vpack.c.b16 %v405_v40, %v404_v33  ;;  %v181_v57 = vrot.slane %v179_v48, 5  ;;  %v146_v58 = vshrl.u32 %v30_v44, 16  ;;  %v176_v59 = vor.u32 %v175_v53, %v172_v47  ;;  %588 = vmatpush.bf16.msra.mxu0 %v1099_v12  ;;  %1118 = vmatpush.bf16.msra.mxu3 %v1099_v12  ;;  %v1095_v47 = vld [vmem:[%s1631_s1] sm:$0xff] }
  0x26   :  { %400 = vrot.lane.b32.xlu2 %v386_v45, %s1162_s27  ;;  %v185_v60 = vrot.slane %v183_v54, 4  ;;  %v149_v63 = vshll.u32 %v30_v44, 16  ;;  %v155_v0 = vshll.u32 %v1384_v50, 16  ;;  %v287_v3 = vrot.slane %v285_v46, 4 }
  0x27   :  { %1047 = vmatmul.msk.bf16.vlgmr.msra.gmra.mxu1 %vm428_vm6, %v420_v51  ;;  %v191_v4 = vrot.slane %v189_v11, 5  ;;  %v148_v5 = vrot.slane %v146_v58, 4  ;;  %v159_v6 = vshrl.u32 %v1384_v50, 16  ;;  %v177_v7 = vrot.slane %v176_v59, 4  ;;  %v244_v58 = vld [vmem:[%s1630_s0 + $0x24] sm:$0xe] }
  0x28   :  { %v186_v8 = vor.u32 %v185_v60, %v181_v57  ;;  %v151_v9 = vrot.slane %v149_v63, 5  ;;  %v157_v10 = vrot.slane %v155_v0, 5  ;;  %v165_v15 = vshll.u32 %v1394_v62, 16 }
  0x29   :  { %v161_v14 = vrot.slane %v159_v6, 4  ;;  %v286_v16 = vsel %vm1341_vm5, %v960_v52, %v285_v46  ;;  %v182_v18 = vsel %vm1234_vm2, %v177_v7, %v181_v57  ;;  %v289_v22 = vsel %vm1341_vm5, %v287_v3, %v288_v55  ;;  %589 = vmatpush.bf16.msra.mxu0 %v1098_v13  ;;  %1119 = vmatpush.bf16.msra.mxu3 %v1098_v13 }
  0x2a   :  { %v187_v20 = vrot.slane %v186_v8, 4  ;;  %v152_v21 = vor.u32 %v151_v9, %v148_v5  ;;  %v374_v24 = vunpack.c.l.b16 %v182_v18  ;;  %v167_v28 = vrot.slane %v165_v15, 5  ;;  %v246_v15 = vld [vmem:[%s1630_s0 + $0x3c] sm:$0xe] }
  0x2b   :  { %v162_v26 = vor.u32 %v161_v14, %v157_v10  ;;  %v406_v32 = vunpack.c.l.b16 %v286_v16  ;;  %v407_v33 = vunpack.c.l.b16 %v289_v22  ;;  %v292_v46 = vrot.slane %v1242_v27, 5 }
  0x2c   :  { %v192_v29 = vsel %vm1234_vm2, %v187_v20, %v191_v4  ;;  %v153_v30 = vrot.slane %v152_v21, 4  ;;  %v961_v48 = vrot.slane %v243_v23, 9  ;;  %v295_v52 = vrot.slane %v1252_v41, 5  ;;  %v248_v23 = vld [vmem:[%s1630_s0 + $0x54] sm:$0xe] }
  0x2d   :  { %v375_v2 = vunpack.c.l.b16 %v192_v29  ;;  %v163_v31 = vrot.slane %v162_v26, 4  ;;  %590 = vmatpush.bf16.msra.mxu0 %v1097_v1  ;;  %1120 = vmatpush.bf16.msra.mxu3 %v1097_v1  ;;  %v421_v44 = vpack.c.b16 %v407_v33, %v406_v32  ;;  %v294_v51 = vrot.slane %v292_v46, 4  ;;  %v247_v1 = vld [vmem:[%s1630_s0 + $0x48] sm:$0xe] }
  0x2e   :  { %v158_v35 = vsel %vm1234_vm2, %v153_v30, %v157_v10  ;;  %v293_v27 = vsel %vm1341_vm5, %v961_v48, %v292_v46  ;;  %v299_v11 = vrot.slane %v1268_v56, 5  ;;  %v962_v41 = vrot.slane %v244_v58, 9  ;;  %v245_v56 = vld [vmem:[%s1630_s0 + $0x30] sm:$0xe]  ;;  %v1093_v30 = vld [vmem:[%s1630_s0 + $0x48] sm:$0xff]  ;;  %v1094_v46 = vld [vmem:[%s1630_s0 + $0x54] sm:$0xff] }
  0x2f   :  { %v385_v36 = vpack.c.b16 %v375_v2, %v374_v24  ;;  %v168_v37 = vsel %vm1234_vm2, %v163_v31, %v167_v28  ;;  %v372_v39 = vunpack.c.l.b16 %v158_v35  ;;  %v296_v53 = vsel %vm1341_vm5, %v294_v51, %v295_v52  ;;  %v1087_v28 = vld [vmem:[%s1630_s0] sm:$0xff] }
  0x30   :  { %v373_v40 = vunpack.c.l.b16 %v168_v37  ;;  %v408_v54 = vunpack.c.l.b16 %v293_v27  ;;  %v409_v55 = vunpack.c.l.b16 %v296_v53  ;;  %v301_v59 = vrot.slane %v299_v11, 4 }
  0x31   :  { %398 = vrot.lane.b32.xlu1 %v385_v36, %s1162_s27  ;;  %591 = vmatpush.bf16.msra.mxu0 %v1096_v43  ;;  %v302_v60 = vrot.slane %v1277_v61, 5  ;;  %v300_v63 = vsel %vm1341_vm5, %v962_v41, %v299_v11  ;;  %v306_v5 = vrot.slane %v1384_v50, 5  ;;  %v309_v6 = vrot.slane %v1394_v62, 5 }
  0x32   :  { %v384_v45 = vpack.c.b16 %v373_v40, %v372_v39  ;;  %1121 = vmatpush.bf16.msra.mxu3 %v1096_v43  ;;  %v422_v57 = vpack.c.b16 %v409_v55, %v408_v54  ;;  %v410_v12 = vunpack.c.l.b16 %v300_v63  ;;  %v963_v61 = vrot.slane %v245_v56, 9 }
  0x33   :  { %v303_v0 = vsel %vm1341_vm5, %v301_v59, %v302_v60  ;;  %v308_v7 = vrot.slane %v306_v5, 4  ;;  %v313_v50 = vrot.slane %v1363_v34, 5  ;;  %v316_v62 = vrot.slane %v1374_v42, 5 }
  0x34   :  { %396 = vrot.lane.b32.xlu2 %v384_v45, %s1162_s27  ;;  %v411_v3 = vunpack.c.l.b16 %v303_v0  ;;  %v307_v8 = vsel %vm1341_vm5, %v963_v61, %v306_v5  ;;  %v964_v16 = vrot.slane %v246_v15, 9  ;;  %v320_v2 = vrot.slane %v1311_v38, 5  ;;  %v1088_v38 = vld [vmem:[%s1630_s0 + $0xc] sm:$0xff]  ;;  %v1111_v61 = vld [vmem:[%s1633_s3 + $0x20] sm:$0xff] }
  0x35   :  { %592 = vmatpush.bf16.msra.mxu0 %v1095_v47  ;;  %v310_v9 = vsel %vm1341_vm5, %v308_v7, %v309_v6  ;;  %v412_v10 = vunpack.c.l.b16 %v307_v8  ;;  %v315_v18 = vrot.slane %v313_v50, 4  ;;  %v323_v31 = vrot.slane %v1321_v49, 5  ;;  %v1091_v5 = vld [vmem:[%s1630_s0 + $0x30] sm:$0xff] }
  0x36   :  { %1122 = vmatpush.bf16.msra.mxu3 %v1095_v47  ;;  %v423_v4 = vpack.c.b16 %v411_v3, %v410_v12  ;;  %v413_v13 = vunpack.c.l.b16 %v310_v9  ;;  %v314_v20 = vsel %vm1341_vm5, %v964_v16, %v313_v50  ;;  %v965_v33 = vrot.slane %v247_v1, 9  ;;  %v1114_v12 = vld [vmem:[%s1633_s3 + $0x38] sm:$0xff]  ;;  %v1113_v3 = vld [vmem:[%s1633_s3 + $0x30] sm:$0xff] }
  0x37   :  { %1048 = vmatmul.msk.bf16.gmra.mxu1 %vm428_vm6, %v421_v44  ;;  %v317_v21 = vsel %vm1341_vm5, %v315_v18, %v316_v62  ;;  %v414_v22 = vunpack.c.l.b16 %v314_v20  ;;  %v322_v35 = vrot.slane %v320_v2, 4  ;;  %v327_v47 = vrot.slane %v1293_v17, 5  ;;  %v1089_v17 = vld [vmem:[%s1630_s0 + $0x18] sm:$0xff]  ;;  %775 = vmatpush.bf16.msra.mxu2 %v1114_v12  ;;  %v1109_v16 = vld [vmem:[%s1633_s3 + $0x10] sm:$0xff]  ;;  %v1108_v18 = vld [vmem:[%s1633_s3 + $0x8] sm:$0xff] }
  0x38   :  { %v424_v14 = vpack.c.b16 %v413_v13, %v412_v10  ;;  %v415_v24 = vunpack.c.l.b16 %v317_v21  ;;  %v321_v36 = vsel %vm1341_vm5, %v965_v33, %v320_v2  ;;  %v330_v48 = vrot.slane %v1301_v25, 5  ;;  %v1092_v9 = vld [vmem:[%s1630_s0 + $0x3c] sm:$0xff] }
  0x39   :  { %v324_v37 = vsel %vm1341_vm5, %v322_v35, %v323_v31  ;;  %v416_v39 = vunpack.c.l.b16 %v321_v36  ;;  %v966_v51 = vrot.slane %v248_v23, 9  ;;  %v329_v27 = vrot.slane %v327_v47, 4  ;;  %v1110_v50 = vld [vmem:[%s1633_s3 + $0x18] sm:$0xff]  ;;  %v1107_v21 = vld [vmem:[%s1633_s3] sm:$0xff] }
  0x3a   :  { %v425_v26 = vpack.c.b16 %v415_v24, %v414_v22  ;;  %v417_v40 = vunpack.c.l.b16 %v324_v37  ;;  %1123 = vmatpush.bf16.msrb.mxu3 %v1114_v12  ;;  %vm927_vm8 = vcmask 1041409   ;;  %vm929_vm9 = vcmask 1042434  }
  0x3b   :  { %v328_v53 = vsel %vm1341_vm5, %v966_v51, %v327_v47  ;;  %v331_v54 = vsel %vm1341_vm5, %v329_v27, %v330_v48  ;;  %776 = vmatpush.bf16.msra.mxu2 %v1113_v3  ;;  %vm931_vm10 = vcmask 1043459   ;;  %vm933_vm11 = vcmask 1044484  }
  0x3c   :  { %v426_v43 = vpack.c.b16 %v417_v40, %v416_v39  ;;  %v418_v55 = vunpack.c.l.b16 %v328_v53  ;;  %vm935_vm12 = vcmask 1045509   ;;  %vm937_vm13 = vcmask 1046534  }
  0x3d   :  { %vm939_vm14 = vcmask 1047559  }
  0x3e   :  { %1124 = vmatpush.bf16.msrb.mxu3 %v1113_v3 }
  0x47   :  { %1049 = vmatmul.msk.bf16.gmra.mxu1 %vm428_vm6, %v422_v57  ;;  %v419_v57 = vunpack.c.l.b16 %v331_v54 }
  0x49   :  { %v427_v11 = vpack.c.b16 %v419_v57, %v418_v55 }
  0x57   :  { %1050 = vmatmul.msk.bf16.gmra.mxu1 %vm428_vm6, %v423_v4  ;;  %v1112_v4 = vld [vmem:[%s1633_s3 + $0x28] sm:$0xff] }
  0x58   :  { %777 = vmatpush.bf16.msra.mxu2 %v1112_v4  ;;  %1125 = vmatpush.bf16.msrb.mxu3 %v1112_v4 }
  0x5c   :  { %778 = vmatpush.bf16.msra.mxu2 %v1111_v61  ;;  %1126 = vmatpush.bf16.msrb.mxu3 %v1111_v61 }
  0x60   :  { %779 = vmatpush.bf16.msra.mxu2 %v1110_v50  ;;  %1127 = vmatpush.bf16.msrb.mxu3 %v1110_v50 }
  0x64   :  { %780 = vmatpush.bf16.msra.mxu2 %v1109_v16  ;;  %1128 = vmatpush.bf16.msrb.mxu3 %v1109_v16 }
  0x67   :  { %1051 = vmatmul.msk.bf16.gmra.mxu1 %vm428_vm6, %v424_v14 }
  0x68   :  { %781 = vmatpush.bf16.msra.mxu2 %v1108_v18  ;;  %1129 = vmatpush.bf16.msrb.mxu3 %v1108_v18 }
  0x6c   :  { %782 = vmatpush.bf16.msra.mxu2 %v1107_v21  ;;  %1130 = vmatpush.bf16.msrb.mxu3 %v1107_v21 }
  0x77   :  { %1052 = vmatmul.msk.bf16.gmra.mxu1 %vm428_vm6, %v425_v26 }
  0x80   :  { %v401_v29 = vpop.permute.xlu2 %400 }
  0x81   :  { %v389_v34 = vpop.permute.xlu0 %388  ;;  %v455_v32 = vsel %vm428_vm6, %v1093_v30, %v401_v29 }
  0x82   :  { %v431_v42 = vsel %vm428_vm6, %v1087_v28, %v389_v34  ;;  %623 = vmatmul.bf16.vlgmr.msra.gmra.mxu3 %v455_v32  ;;  %v1564_v28 = vld [vmem:[%s1632_s2] ss:$0 sm:$0xff] }
  0x83   :  { %593 = vmatmul.bf16.vlgmr.msra.gmra.mxu0 %v431_v42 }
  0x87   :  { %1053 = vmatmul.msk.bf16.gmra.mxu1 %vm428_vm6, %v426_v43 }
  0x89   :  { %v391_v44 = vpop.permute.xlu0 %390 }
  0x8a   :  { %v435_v49 = vsel %vm428_vm6, %v1088_v38, %v391_v44  ;;  %v393_v25 = vpop.permute.xlu1 %392 }
  0x8b   :  { %v439_v58 = vsel %vm428_vm6, %v1089_v17, %v393_v25 }
  0x8e   :  { %v397_v6 = vpop.permute.xlu2 %396 }
  0x8f   :  { %v447_v7 = vsel %vm428_vm6, %v1091_v5, %v397_v6 }
  0x92   :  { %v395_v60 = vpop.permute.xlu1 %394 }
  0x93   :  { %598 = vmatmul.bf16.gmra.mxu0 %v435_v49  ;;  %v443_v63 = vsel %vm428_vm6, %v1090_v19, %v395_v60 }
  0x94   :  { %v403_v45 = vpop.permute.xlu0 %402 }
  0x95   :  { %v459_v52 = vsel %vm428_vm6, %v1094_v46, %v403_v45 }
  0x96   :  { %628 = vmatmul.bf16.gmra.mxu3 %v459_v52 }
  0x97   :  { %1054 = vmatmul.msk.bf16.gmra.mxu1 %vm428_vm6, %v427_v11 }
  0xa3   :  { %603 = vmatmul.bf16.gmra.mxu0 %v439_v58  ;;  %v399_v10 = vpop.permute.xlu1 %398 }
  0xa4   :  { %v643_v41 = vpop.f32.mrf.mxu1  ;;  %v451_v14 = vsel %vm428_vm6, %v1092_v9, %v399_v10 }
  0xac   :  { %v645_v59 = vpop.f32.mrf.mxu1 }
  0xb3   :  { %608 = vmatmul.bf16.gmra.mxu0 %v443_v63 }
  0xb4   :  { %v1513_v0 = vpop.f32.mrf.mxu1 }
  0xbc   :  { %v650_v56 = vpop.f32.mrf.mxu1 }
  0xc3   :  { %613 = vmatmul.bf16.gmra.mxu0 %v447_v7 }
  0xc4   :  { %v1531_v8 = vpop.f32.mrf.mxu1 }
  0xcc   :  { %v1536_v13 = vpop.f32.mrf.mxu1 }
  0xd3   :  { %618 = vmatmul.bf16.gmra.mxu0 %v451_v14 }
  0xd4   :  { %v1539_v15 = vpop.f32.mrf.mxu1 }
  0xdc   :  { %v1544_v62 = vpop.f32.mrf.mxu1 }
  0xe4   :  { %v1552_v20 = vpop.f32.mrf.mxu1 }
  0xec   :  { %v1557_v22 = vpop.f32.mrf.mxu1 }
  0xf4   :  { %v1559_v24 = vpop.f32.mrf.mxu1 }
  0xfc   :  { %v1566_v34 = vpop.f32.mrf.mxu1 }
 0x100   :  { %v594_v26 = vpop.f32.mrf.mxu0 }
 0x101   :  { %v595_v29 = vadd.f32 %v1564_v28, %v594_v26 }
 0x103   :  { %v644_v1 = vadd.f32 %v643_v41, %v595_v29 }
 0x104   :  { %v673_v31 = vpop.f32.mrf.mxu1 }
 0x105   :  { %v624_v30 = vpop.f32.mrf.mxu3  ;;  %v683_v33 = vmax.f32 %v644_v1, 0.0 }
 0x106   :  { %v625_v36 = vadd.f32 %v1564_v28, %v624_v30 }
 0x108   :  { %v596_v42 = vpop.f32.mrf.mxu0  ;;  %v674_v39 = vadd.f32 %v673_v31, %v625_v36 }
 0x109   :  { %v597_v2 = vadd.f32 %v1564_v28, %v596_v42 }
 0x10a   :  { %v695_v49 = vmax.f32 %v674_v39, 0.0 }
 0x10b   :  { %v646_v32 = vadd.f32 %v645_v59, %v597_v2 }
 0x10c   :  { %v675_v38 = vpop.f32.mrf.mxu1 }
 0x10d   :  { %v684_v35 = vmax.f32 %v646_v32, 0.0  ;;  %v626_v43 = vpop.f32.mrf.mxu3 }
 0x10e   :  { %v627_v44 = vadd.f32 %v1564_v28, %v626_v43 }
 0x10f   :  { %v699_v37 = vpack.c.bf16 %v684_v35, %v683_v33 }
 0x110   :  { %v599_v40 = vpop.f32.mrf.mxu0  ;;  %v676_v45 = vadd.f32 %v675_v38, %v627_v44  ;;  %v840_v38 = vlaneseq }
 0x111   :  { %783 = vmatmul.bf16.vlgmr.msra.gmra.mxu2 %v699_v37  ;;  %v600_v46 = vadd.f32 %v1564_v28, %v599_v40 }
 0x112   :  { %v696_v23 = vmax.f32 %v676_v45, 0.0  ;;  %v1596_v45 = vld [vmem:[%s1634_s4] ss:$0 sm:$0xff]  ;;  %s1164_s4 = smov [#allocation2]  }
 0x113   :  { %v649_v51 = vadd.f32 %v1513_v0, %v600_v46  ;;  %s948_s14 = sshll.u32 %s1164_s4, 4  ;;  %s949_s14 = int_to_ptr.vmem [resolvable:$true] %s948_s14 }
 0x114   :  { %v705_v47 = vpack.c.bf16 %v696_v23, %v695_v49  ;;  %v678_v57 = vpop.f32.mrf.mxu1 }
 0x115   :  { %v685_v54 = vmax.f32 %v649_v51, 0.0 }
 0x116   :  { %813 = vmatmul.bf16.vlgmr.msrb.gmra.mxu3 %v705_v47  ;;  %v1163_v47 = vmov 0.0  }
 0x118   :  { %v601_v48 = vpop.f32.mrf.mxu0 }
 0x119   :  { %v602_v52 = vadd.f32 %v1564_v28, %v601_v48  ;;  %v629_v53 = vpop.f32.mrf.mxu3 }
 0x11a   :  { %v630_v17 = vadd.f32 %v1564_v28, %v629_v53 }
 0x11b   :  { %v651_v27 = vadd.f32 %v650_v56, %v602_v52 }
 0x11c   :  { %v679_v58 = vadd.f32 %v678_v57, %v630_v17  ;;  %v680_v60 = vpop.f32.mrf.mxu1 }
 0x11d   :  { %v686_v55 = vmax.f32 %v651_v27, 0.0 }
 0x11e   :  { %v697_v63 = vmax.f32 %v679_v58, 0.0 }
 0x11f   :  { %v700_v11 = vpack.c.bf16 %v686_v55, %v685_v54 }
 0x120   :  { %v604_v25 = vpop.f32.mrf.mxu0 }
 0x121   :  { %788 = vmatmul.bf16.gmra.mxu2 %v700_v11  ;;  %v631_v41 = vpop.f32.mrf.mxu3  ;;  %v605_v59 = vadd.f32 %v1564_v28, %v604_v25 }
 0x122   :  { %v632_v19 = vadd.f32 %v1564_v28, %v631_v41 }
 0x123   :  { %v654_v3 = vadd.f32 %v1531_v8, %v605_v59 }
 0x124   :  { %v681_v0 = vadd.f32 %v680_v60, %v632_v19 }
 0x125   :  { %v687_v61 = vmax.f32 %v654_v3, 0.0 }
 0x126   :  { %v698_v56 = vmax.f32 %v681_v0, 0.0 }
 0x128   :  { %v606_v12 = vpop.f32.mrf.mxu0  ;;  %v706_v6 = vpack.c.bf16 %v698_v56, %v697_v63 }
 0x129   :  { %v607_v4 = vadd.f32 %v1564_v28, %v606_v12 }
 0x12a   :  { %818 = vmatmul.bf16.gmra.mxu3 %v706_v6 }
 0x12b   :  { %v656_v5 = vadd.f32 %v1536_v13, %v607_v4 }
 0x12d   :  { %v688_v7 = vmax.f32 %v656_v5, 0.0 }
 0x12f   :  { %v701_v9 = vpack.c.bf16 %v688_v7, %v687_v61 }
 0x130   :  { %v609_v10 = vpop.f32.mrf.mxu0 }
 0x131   :  { %793 = vmatmul.bf16.gmra.mxu2 %v701_v9  ;;  %v610_v14 = vadd.f32 %v1564_v28, %v609_v10 }
 0x133   :  { %v659_v16 = vadd.f32 %v1539_v15, %v610_v14 }
 0x135   :  { %v689_v21 = vmax.f32 %v659_v16, 0.0 }
 0x138   :  { %v611_v50 = vpop.f32.mrf.mxu0 }
 0x139   :  { %v612_v18 = vadd.f32 %v1564_v28, %v611_v50 }
 0x13b   :  { %v661_v8 = vadd.f32 %v1544_v62, %v612_v18 }
 0x13d   :  { %v690_v26 = vmax.f32 %v661_v8, 0.0 }
 0x13f   :  { %v702_v29 = vpack.c.bf16 %v690_v26, %v689_v21 }
 0x140   :  { %v614_v13 = vpop.f32.mrf.mxu0 }
 0x141   :  { %798 = vmatmul.bf16.gmra.mxu2 %v702_v29  ;;  %v615_v42 = vadd.f32 %v1564_v28, %v614_v13 }
 0x143   :  { %v664_v1 = vadd.f32 %v1552_v20, %v615_v42 }
 0x145   :  { %v691_v32 = vmax.f32 %v664_v1, 0.0 }
 0x148   :  { %v616_v30 = vpop.f32.mrf.mxu0 }
 0x149   :  { %v617_v2 = vadd.f32 %v1564_v28, %v616_v30 }
 0x14b   :  { %v666_v31 = vadd.f32 %v1557_v22, %v617_v2  ;;  %v841_v22 = vshrl.u32 %v840_v38, 7 }
 0x14d   :  { %v692_v15 = vmax.f32 %v666_v31, 0.0  ;;  %v842_v46 = vadd.s32 8, %v841_v22 }
 0x14f   :  { %v703_v33 = vpack.c.bf16 %v692_v15, %v691_v32  ;;  %vm844_vm7 = vcmp.lt.s32.totalorder %v842_v46, 12 }
 0x150   :  { %v619_v35 = vpop.f32.mrf.mxu0  ;;  %v1600_v48 = vsel %vm844_vm7, 0.083333336, %v1163_v47 }
 0x151   :  { %803 = vmatmul.bf16.gmra.mxu2 %v703_v33  ;;  %v620_v62 = vadd.f32 %v1564_v28, %v619_v35 }
 0x153   :  { %v669_v37 = vadd.f32 %v1559_v24, %v620_v62 }
 0x155   :  { %v693_v43 = vmax.f32 %v669_v37, 0.0 }
 0x158   :  { %v621_v36 = vpop.f32.mrf.mxu0 }
 0x159   :  { %v622_v39 = vadd.f32 %v1564_v28, %v621_v36 }
 0x15b   :  { %v671_v40 = vadd.f32 %v1566_v34, %v622_v39 }
 0x15d   :  { %v694_v20 = vmax.f32 %v671_v40, 0.0 }
 0x15f   :  { %v704_v44 = vpack.c.bf16 %v694_v20, %v693_v43 }
 0x161   :  { %808 = vmatmul.bf16.gmra.mxu2 %v704_v44 }
 0x194   :  { %v784_v49 = vpop.f32.mrf.mxu2 }
 0x195   :  { %v785_v23 = vadd.f32 %v1596_v45, %v784_v49 }
 0x197   :  { %v824_v28 = vmax.f32 %v785_v23, 0.0 }
 0x199   :  { %v847_v52 = vmul.f32 0.083333336, %v824_v28  ;;  %v814_v9 = vpop.f32.mrf.mxu3 }
 0x19a   :  { %v815_v33 = vadd.f32 %v1596_v45, %v814_v9 }
 0x19c   :  { %v786_v24 = vpop.f32.mrf.mxu2  ;;  %v836_v49 = vmax.f32 %v815_v33, 0.0 }
 0x19d   :  { %v787_v34 = vadd.f32 %v1596_v45, %v786_v24 }
 0x19f   :  { %v825_v51 = vmax.f32 %v787_v34, 0.0 }
 0x1a1   :  { %v848_v27 = vmul.f32 %v1600_v48, %v825_v51  ;;  %v816_v18 = vpop.f32.mrf.mxu3 }
 0x1a2   :  { %v817_v35 = vadd.f32 %v1596_v45, %v816_v18 }
 0x1a3   :  { %v863_v53 = vadd.f32 %v848_v27, %v847_v52  ;;  %v859_v27 = vmul.f32 0.083333336, %v836_v49 }
 0x1a4   :  { %v789_v54 = vpop.f32.mrf.mxu2  ;;  %v837_v46 = vmax.f32 %v817_v35, 0.0 }
 0x1a5   :  { %v790_v55 = vadd.f32 %v1596_v45, %v789_v54  ;;  %v864_v57 = vrot.slane %v863_v53, 4 }
 0x1a7   :  { %v826_v17 = vmax.f32 %v790_v55, 0.0  ;;  %v865_v58 = vadd.f32 %v864_v57, %v863_v53  ;;  %v860_v53 = vmul.f32 %v1600_v48, %v837_v46 }
 0x1a9   :  { %v849_v59 = vmul.f32 0.083333336, %v826_v17  ;;  %v866_v60 = vrot.slane %v865_v58, 2 }
 0x1ab   :  { %v867_v3 = vadd.f32 %v866_v60, %v865_v58  ;;  %v905_v58 = vadd.f32 %v860_v53, %v859_v27 }
 0x1ac   :  { %v791_v11 = vpop.f32.mrf.mxu2 }
 0x1ad   :  { %v792_v25 = vadd.f32 %v1596_v45, %v791_v11  ;;  %v868_v5 = vrot.slane %v867_v3, 1  ;;  %v819_v21 = vpop.f32.mrf.mxu3 }
 0x1ae   :  { %v820_v37 = vadd.f32 %v1596_v45, %v819_v21 }
 0x1af   :  { %v827_v41 = vmax.f32 %v792_v25, 0.0  ;;  %v869_v10 = vadd.f32 %v868_v5, %v867_v3 }
 0x1b0   :  { %v838_v24 = vmax.f32 %v820_v37, 0.0 }
 0x1b1   :  { %v850_v19 = vmul.f32 %v1600_v48, %v827_v41 }
 0x1b2   :  { %v861_v57 = vmul.f32 0.083333336, %v838_v24 }
 0x1b3   :  { %v870_v63 = vadd.f32 %v850_v19, %v849_v59 }
 0x1b4   :  { %v794_v0 = vpop.f32.mrf.mxu2 }
 0x1b5   :  { %v871_v12 = vrot.slane %v870_v63, 4  ;;  %v795_v42 = vadd.f32 %v1596_v45, %v794_v0  ;;  %v821_v31 = vpop.f32.mrf.mxu3  ;;  %v906_v0 = vrot.slane %v905_v58, 4 }
 0x1b6   :  { %v822_v39 = vadd.f32 %v1596_v45, %v821_v31 }
 0x1b7   :  { %v872_v4 = vadd.f32 %v871_v12, %v870_v63  ;;  %v828_v15 = vmax.f32 %v795_v42, 0.0  ;;  %v907_v9 = vadd.f32 %v906_v0, %v905_v58 }
 0x1b8   :  { %v839_v28 = vmax.f32 %v822_v39, 0.0 }
 0x1b9   :  { %v873_v56 = vrot.slane %v872_v4, 2  ;;  %v851_v22 = vmul.f32 0.083333336, %v828_v15 }
 0x1ba   :  { %v862_v11 = vmul.f32 %v1600_v48, %v839_v28 }
 0x1bb   :  { %v874_v6 = vadd.f32 %v873_v56, %v872_v4 }
 0x1bc   :  { %v796_v61 = vpop.f32.mrf.mxu2  ;;  %v912_v59 = vadd.f32 %v862_v11, %v861_v57 }
 0x1bd   :  { %v875_v7 = vrot.slane %v874_v6, 1  ;;  %v797_v29 = vadd.f32 %v1596_v45, %v796_v61 }
 0x1be   :  { %v913_v4 = vrot.slane %v912_v59, 4 }
 0x1bf   :  { %v876_v14 = vadd.f32 %v875_v7, %v874_v6  ;;  %v829_v1 = vmax.f32 %v797_v29, 0.0  ;;  %v908_v29 = vrot.slane %v907_v9, 2 }
 0x1c1   :  { %v1606_v50 = vsel %vm927_vm8, %v876_v14, %v869_v10  ;;  %v852_v43 = vmul.f32 %v1600_v48, %v829_v1  ;;  %v914_v14 = vadd.f32 %v913_v4, %v912_v59 }
 0x1c3   :  { %v877_v47 = vadd.f32 %v852_v43, %v851_v22  ;;  %v915_v42 = vrot.slane %v914_v14, 2 }
 0x1c4   :  { %v799_v16 = vpop.f32.mrf.mxu2 }
 0x1c5   :  { %v800_v30 = vadd.f32 %v1596_v45, %v799_v16  ;;  %v878_v17 = vrot.slane %v877_v47, 4  ;;  %v916_v15 = vadd.f32 %v915_v42, %v914_v14 }
 0x1c7   :  { %v830_v36 = vmax.f32 %v800_v30, 0.0  ;;  %v879_v60 = vadd.f32 %v878_v17, %v877_v47 }
 0x1c9   :  { %v853_v23 = vmul.f32 0.083333336, %v830_v36  ;;  %v880_v6 = vrot.slane %v879_v60, 2 }
 0x1cc   :  { %v801_v8 = vpop.f32.mrf.mxu2 }
 0x1cd   :  { %v802_v13 = vadd.f32 %v1596_v45, %v801_v8  ;;  %v881_v8 = vadd.f32 %v880_v6, %v879_v60 }
 0x1cf   :  { %v831_v32 = vmax.f32 %v802_v13, 0.0  ;;  %v882_v1 = vrot.slane %v881_v8, 1 }
 0x1d1   :  { %v854_v44 = vmul.f32 %v1600_v48, %v831_v32  ;;  %v883_v35 = vadd.f32 %v882_v1, %v881_v8 }
 0x1d3   :  { %v884_v52 = vadd.f32 %v854_v44, %v853_v23  ;;  %v930_v43 = vsel %vm929_vm9, %v883_v35, %v1606_v50 }
 0x1d4   :  { %v804_v26 = vpop.f32.mrf.mxu2 }
 0x1d5   :  { %v805_v2 = vadd.f32 %v1596_v45, %v804_v26  ;;  %v885_v25 = vrot.slane %v884_v52, 4 }
 0x1d7   :  { %v832_v20 = vmax.f32 %v805_v2, 0.0  ;;  %v886_v63 = vadd.f32 %v885_v25, %v884_v52 }
 0x1d9   :  { %v855_v51 = vmul.f32 0.083333336, %v832_v20  ;;  %v887_v61 = vrot.slane %v886_v63, 2 }
 0x1db   :  { %v888_v21 = vadd.f32 %v887_v61, %v886_v63 }
 0x1dc   :  { %v806_v62 = vpop.f32.mrf.mxu2 }
 0x1dd   :  { %v807_v40 = vadd.f32 %v1596_v45, %v806_v62  ;;  %v889_v2 = vrot.slane %v888_v21, 1 }
 0x1df   :  { %v833_v38 = vmax.f32 %v807_v40, 0.0  ;;  %v890_v62 = vadd.f32 %v889_v2, %v888_v21  ;;  %v917_v40 = vrot.slane %v916_v15, 1 }
 0x1e1   :  { %v856_v34 = vmul.f32 %v1600_v48, %v833_v38  ;;  %v932_v44 = vsel %vm931_vm10, %v890_v62, %v930_v43  ;;  %v918_v49 = vadd.f32 %v917_v40, %v916_v15 }
 0x1e3   :  { %v891_v54 = vadd.f32 %v856_v34, %v855_v51 }
 0x1e4   :  { %v809_v55 = vpop.f32.mrf.mxu2 }
 0x1e5   :  { %v892_v41 = vrot.slane %v891_v54, 4  ;;  %v810_v19 = vadd.f32 %v1596_v45, %v809_v55 }
 0x1e7   :  { %v893_v12 = vadd.f32 %v892_v41, %v891_v54  ;;  %v834_v56 = vmax.f32 %v810_v19, 0.0 }
 0x1e9   :  { %v894_v10 = vrot.slane %v893_v12, 2  ;;  %v857_v16 = vmul.f32 0.083333336, %v834_v56 }
 0x1eb   :  { %v895_v13 = vadd.f32 %v894_v10, %v893_v12 }
 0x1ec   :  { %v811_v3 = vpop.f32.mrf.mxu2 }
 0x1ed   :  { %v812_v5 = vadd.f32 %v1596_v45, %v811_v3  ;;  %v909_v45 = vadd.f32 %v908_v29, %v907_v9  ;;  %v896_v32 = vrot.slane %v895_v13, 1 }
 0x1ef   :  { %v835_v7 = vmax.f32 %v812_v5, 0.0  ;;  %v910_v37 = vrot.slane %v909_v45, 1 }
 0x1f1   :  { %v858_v18 = vmul.f32 %v1600_v48, %v835_v7  ;;  %v897_v48 = vadd.f32 %v896_v32, %v895_v13  ;;  %v911_v38 = vadd.f32 %v910_v37, %v909_v45 }
 0x1f3   :  { %v898_v26 = vadd.f32 %v858_v18, %v857_v16  ;;  %v934_v22 = vsel %vm933_vm11, %v897_v48, %v932_v44 }
 0x1f5   :  { %v899_v30 = vrot.slane %v898_v26, 4 }
 0x1f7   :  { %v900_v31 = vadd.f32 %v899_v30, %v898_v26 }
 0x1f9   :  { %v901_v33 = vrot.slane %v900_v31, 2 }
 0x1fb   :  { %v902_v36 = vadd.f32 %v901_v33, %v900_v31 }
 0x1fd   :  { %v903_v39 = vrot.slane %v902_v36, 1 }
 0x1ff   :  { %v904_v20 = vadd.f32 %v903_v39, %v902_v36 }
 0x201   :  { %v936_v46 = vsel %vm935_vm12, %v904_v20, %v934_v22 }
 0x202   :  { %v938_v23 = vsel %vm937_vm13, %v911_v38, %v936_v46 }
 0x203   :  { %v940_v24 = vsel %vm939_vm14, %v918_v49, %v938_v23 }
 0x204   :  { %942 = vst [vmem:[#allocation2] sm:$0xff] %v940_v24 }
 0x205   :  { %953 = dma.vmem_to_hbm [thread:$0]  %s949_s14, 128, %s951_s17, [#allocation3]  }
 0x206   :  { %1160 = dma.done.wait [#allocation3], 128  }
 0x207   :  { %1161 = vsyncadd [#allocation3], 4294967168 }
 0x208   :  { %958 = vsyncpa [#allocation3], 1 }

</bundles_post_ra>
